<compile_context>
chip_gen: v6e
topology: v6e:2x2x1
jax: 0.10.0
libtpu: 0.0.40
codegen_flags: <defaults>
</compile_context>

<pallas_src>
import jax
import jax.numpy as jnp
from jax import lax
from jax.experimental import pallas as pl
from jax.experimental.pallas import tpu as pltpu


def attention_kernel(x_ref, w_ref, b_ref, c_ref, o_ref):
    # x_ref : (B, S, Dp)   zero-padded lstm_out (whole batch in VMEM)
    # w_ref : (Dp, Dp)     attn weight in [out_dim, in_dim] layout (no transpose)
    # b_ref : (1, Dp)      attn bias (row)
    # c_ref : (1, Dp)      context vector (row)
    # o_ref : (B, Dp)      attended output (lane-dense slab)
    B, S, Dp = x_ref.shape
    x = x_ref[...]                                          # (B, S, Dp)
    x2 = x.reshape(B * S, Dp)                               # trivial sublane regroup

    # energy = tanh(x @ W^T + b): contract x2 dim 1 against W's in-dim (dim 1).
    energy = jnp.tanh(
        lax.dot_general(x2, w_ref[...],
                        dimension_numbers=(((1,), (1,)), ((), ())),
                        preferred_element_type=jnp.float32)
        + b_ref[...])                                       # (B*S, Dp)

    # scores = energy @ context_vector, done on the VPU/XLU (mul + lane reduce)
    scores = jnp.sum((energy * c_ref[...]).reshape(B, S, Dp),
                     axis=-1, keepdims=True)                # (B, S, 1)

    # softmax over the sequence axis (PyTorch dim=1), numerically stable
    m = jnp.max(scores, axis=1, keepdims=True)              # (B, 1, 1)
    e = jnp.exp(scores - m)                                 # (B, S, 1)
    denom = jnp.sum(e, axis=1, keepdims=True)               # (B, 1, 1)
    weights = e * pl.reciprocal(denom, approx=False)        # (B, S, 1)

    # weighted sum of lstm_out over the sequence axis
    attended = jnp.sum(x * weights, axis=1)                 # (B, Dp)
    o_ref[...] = attended.astype(o_ref.dtype)               # single unmasked store


def attention_forward(lstm_out, attn_w, attn_b, context_vector):
    """lstm_out: (B, S, D); attn_w: (D, D) [out, in]; attn_b: (D,); context_vector: (D,)."""
    B, S, D = lstm_out.shape
    Dp = pl.cdiv(D, 128) * 128            # pad feature dim to the 128-lane boundary
    pad = Dp - D

    # Zero-padding preserves semantics exactly: padded weight rows/cols, bias and
    # context entries are 0, so padded energy columns contribute 0 to the scores
    # and padded features of x contribute 0 to the output (sliced off below).
    x_p = jnp.pad(lstm_out, ((0, 0), (0, 0), (0, pad)))
    w_p = jnp.pad(attn_w, ((0, pad), (0, pad)))
    b_p = jnp.pad(attn_b, ((0, pad),)).reshape(1, Dp)
    c_p = jnp.pad(context_vector, ((0, pad),)).reshape(1, Dp)

    out = pl.pallas_call(
        attention_kernel,
        out_shape=jax.ShapeDtypeStruct((B, Dp), lstm_out.dtype),
        grid=(1,),                        # one step: whole problem fits in VMEM
        in_specs=[
            pl.BlockSpec((B, S, Dp), lambda i: (0, 0, 0)),
            pl.BlockSpec((Dp, Dp), lambda i: (0, 0)),
            pl.BlockSpec((1, Dp), lambda i: (0, 0)),
            pl.BlockSpec((1, Dp), lambda i: (0, 0)),
        ],
        out_specs=pl.BlockSpec((B, Dp), lambda i: (0, 0)),
        compiler_params=pltpu.CompilerParams(
            dimension_semantics=("arbitrary",)),
    )(x_p, w_p, b_p, c_p)
    return out[:, :D]


def attention_reference(lstm_out, attn_w, attn_b, context_vector):
    energy = jnp.tanh(jnp.einsum("bsd,od->bso", lstm_out, attn_w) + attn_b)
    scores = jnp.einsum("bso,o->bs", energy, context_vector)
    weights = jax.nn.softmax(scores, axis=1)
    return jnp.sum(lstm_out * weights[..., None], axis=1)


if __name__ == "__main__":
    hidden_dim = 32
    D = hidden_dim * 2          # 64
    B, S = 2, 8

    key = jax.random.PRNGKey(0)
    k_x, k_w, k_b, k_c = jax.random.split(key, 4)

    lstm_out = jax.random.normal(k_x, (B, S, D), dtype=jnp.float32)
    # Deterministic parameter init (nn.Linear(D, D) weight/bias + context vector).
    attn_w = jax.random.uniform(k_w, (D, D), dtype=jnp.float32,
                                minval=-1.0 / jnp.sqrt(D), maxval=1.0 / jnp.sqrt(D))
    attn_b = jax.random.uniform(k_b, (D,), dtype=jnp.float32,
                                minval=-1.0 / jnp.sqrt(D), maxval=1.0 / jnp.sqrt(D))
    context_vector = jax.random.normal(k_c, (D,), dtype=jnp.float32)

    out = attention_forward(lstm_out, attn_w, attn_b, context_vector)
    jax.block_until_ready(out)

    ref = attention_reference(lstm_out, attn_w, attn_b, context_vector)
    assert out.shape == (B, D)
    assert jnp.allclose(out, ref, atol=1e-5, rtol=1e-5), "mismatch vs reference"

    print("KERNEL_OK")
</pallas_src>

<mosaic_0001>
module attributes {stable_mosaic.version = 11 : i64} {
  func.func @attention_kernel(%arg0: i32, %arg1: memref<2x8x128xf32, #tpu.memory_space<vmem>>, %arg2: memref<128x128xf32, #tpu.memory_space<vmem>>, %arg3: memref<1x128xf32, #tpu.memory_space<vmem>>, %arg4: memref<1x128xf32, #tpu.memory_space<vmem>>, %arg5: memref<2x128xf32, #tpu.memory_space<vmem>>) attributes {dimension_semantics = [#tpu.dimension_semantics<arbitrary>], iteration_bounds = array<i64: 1>, scalar_prefetch = 0 : i64, scratch_operands = 0 : i64, tpu.core_type = #tpu.core_type<tc>, window_params = [{pipeline_mode = #tpu.pipeline_mode<synchronous>, transform_indices = @transform_0, window_bounds = array<i64: 2, 8, 128>}, {pipeline_mode = #tpu.pipeline_mode<synchronous>, transform_indices = @transform_1, window_bounds = array<i64: 128, 128>}, {pipeline_mode = #tpu.pipeline_mode<synchronous>, transform_indices = @transform_2, window_bounds = array<i64: 1, 128>}, {pipeline_mode = #tpu.pipeline_mode<synchronous>, transform_indices = @transform_3, window_bounds = array<i64: 1, 128>}, {pipeline_mode = #tpu.pipeline_mode<synchronous>, transform_indices = @transform_4, window_bounds = array<i64: 2, 128>}]} {
    %c0 = arith.constant 0 : index
    %c0_0 = arith.constant 0 : index
    %c0_1 = arith.constant 0 : index
    %0 = vector.load %arg1[%c0, %c0_0, %c0_1] : memref<2x8x128xf32, #tpu.memory_space<vmem>>, vector<2x8x128xf32>
    %1 = vector.shape_cast %0 : vector<2x8x128xf32> to vector<16x128xf32>
    %c0_2 = arith.constant 0 : index
    %c0_3 = arith.constant 0 : index
    %2 = vector.load %arg2[%c0_2, %c0_3] : memref<128x128xf32, #tpu.memory_space<vmem>>, vector<128x128xf32>
    %cst = arith.constant dense<0.000000e+00> : vector<16x128xf32>
    %3 = tpu.matmul %1, %2, %cst {dimension_numbers = #tpu.dot_dimension_numbers<[1], [1], [0], [0], [0, 0, 1, 0], [], []>} : vector<16x128xf32>, vector<128x128xf32>, vector<16x128xf32> -> vector<16x128xf32>
    %c0_4 = arith.constant 0 : index
    %c0_5 = arith.constant 0 : index
    %4 = vector.load %arg3[%c0_4, %c0_5] : memref<1x128xf32, #tpu.memory_space<vmem>>, vector<1x128xf32>
    %5 = vector.broadcast %4 : vector<1x128xf32> to vector<16x128xf32>
    %6 = arith.addf %3, %5 : vector<16x128xf32>
    %7 = math.tanh %6 : vector<16x128xf32>
    %c0_6 = arith.constant 0 : index
    %c0_7 = arith.constant 0 : index
    %8 = vector.load %arg4[%c0_6, %c0_7] : memref<1x128xf32, #tpu.memory_space<vmem>>, vector<1x128xf32>
    %9 = vector.broadcast %8 : vector<1x128xf32> to vector<16x128xf32>
    %10 = arith.mulf %7, %9 : vector<16x128xf32>
    %11 = vector.shape_cast %10 : vector<16x128xf32> to vector<2x8x128xf32>
    %cst_8 = arith.constant dense<0.000000e+00> : vector<2x8xf32>
    %12 = vector.multi_reduction <add>, %11, %cst_8 [2] : vector<2x8x128xf32> to vector<2x8xf32>
    %13 = vector.shape_cast %12 : vector<2x8xf32> to vector<2x8x1xf32>
    %cst_9 = arith.constant dense<0xFF800000> : vector<2x1xf32>
    %14 = vector.multi_reduction <maximumf>, %13, %cst_9 [1] : vector<2x8x1xf32> to vector<2x1xf32>
    %15 = vector.shape_cast %14 : vector<2x1xf32> to vector<2x1x1xf32>
    %16 = vector.broadcast %15 : vector<2x1x1xf32> to vector<2x8x1xf32>
    %17 = arith.subf %13, %16 : vector<2x8x1xf32>
    %18 = math.exp %17 : vector<2x8x1xf32>
    %cst_10 = arith.constant dense<0.000000e+00> : vector<2x1xf32>
    %19 = vector.multi_reduction <add>, %18, %cst_10 [1] : vector<2x8x1xf32> to vector<2x1xf32>
    %20 = vector.shape_cast %19 : vector<2x1xf32> to vector<2x1x1xf32>
    %21 = tpu.reciprocal %20 : vector<2x1x1xf32> -> vector<2x1x1xf32>
    %22 = vector.broadcast %21 : vector<2x1x1xf32> to vector<2x8x1xf32>
    %23 = arith.mulf %18, %22 : vector<2x8x1xf32>
    %24 = vector.broadcast %23 : vector<2x8x1xf32> to vector<2x8x128xf32>
    %25 = arith.mulf %0, %24 : vector<2x8x128xf32>
    %cst_11 = arith.constant dense<0.000000e+00> : vector<2x128xf32>
    %26 = vector.multi_reduction <add>, %25, %cst_11 [1] : vector<2x8x128xf32> to vector<2x128xf32>
    %c0_12 = arith.constant 0 : index
    %c0_13 = arith.constant 0 : index
    %27 = vector.load %arg5[%c0_12, %c0_13] : memref<2x128xf32, #tpu.memory_space<vmem>>, vector<2x128xf32>
    tpu.vector_store %arg5[%c0_12, %c0_13], %26 {strides = array<i32>} : memref<2x128xf32, #tpu.memory_space<vmem>>, vector<2x128xf32>,
    return
  }
  func.func @transform_0(%arg0: i32) -> (i32, i32, i32) {
    %c0_i32 = arith.constant 0 : i32
    %c0_i32_0 = arith.constant 0 : i32
    %c0_i32_1 = arith.constant 0 : i32
    %c0_i32_2 = arith.constant 0 : i32
    return %c0_i32, %c0_i32_0, %c0_i32_1 : i32, i32, i32
  }
  func.func @transform_1(%arg0: i32) -> (i32, i32) {
    %c0_i32 = arith.constant 0 : i32
    %c0_i32_0 = arith.constant 0 : i32
    %c0_i32_1 = arith.constant 0 : i32
    return %c0_i32, %c0_i32_0 : i32, i32
  }
  func.func @transform_2(%arg0: i32) -> (i32, i32) {
    %c0_i32 = arith.constant 0 : i32
    %c0_i32_0 = arith.constant 0 : i32
    %c0_i32_1 = arith.constant 0 : i32
    return %c0_i32, %c0_i32_0 : i32, i32
  }
  func.func @transform_3(%arg0: i32) -> (i32, i32) {
    %c0_i32 = arith.constant 0 : i32
    %c0_i32_0 = arith.constant 0 : i32
    %c0_i32_1 = arith.constant 0 : i32
    return %c0_i32, %c0_i32_0 : i32, i32
  }
  func.func @transform_4(%arg0: i32) -> (i32, i32) {
    %c0_i32 = arith.constant 0 : i32
    %c0_i32_0 = arith.constant 0 : i32
    %c0_i32_1 = arith.constant 0 : i32
    return %c0_i32, %c0_i32_0 : i32, i32
  }
}

</mosaic_0001>

<bundles_post_ra>
// kernel: tpu_custom_call.1
= control target key start
LH: loop header
LB: loop body
LE: loop exit
PB: predicated region body
PF: predicated region fallthrough
CT: control target
= control target key end

     0   :  { %9 = vsyncpa [#allocation3], 0  ;;  %s418_s0 = inlined_call_operand.hbm [shape: f32[2,8,128], index: 0, kind: input, shape index: {}]   ;;  %s419_s1 = inlined_call_operand.hbm [shape: f32[128,128], index: 1, kind: input, shape index: {}]   ;;  %s420_s2 = inlined_call_operand.vmem [shape: f32[1,128], index: 2, kind: input, shape index: {}]   ;;  %s421_s3 = inlined_call_operand.vmem [shape: f32[1,128], index: 3, kind: input, shape index: {}]   ;;  %s422_s4 = inlined_call_operand.hbm [shape: f32[2,128], index: 4, kind: output, shape index: {}]  }
   0x1   :  { %10 = vsyncpa [#allocation6], 0 }
   0x2   :  { %11 = vsyncpa [#allocation4], 0  ;;  %s369_s15 = smov [#allocation2]  }
   0x3   :  { %s17_s16 = sshll.u32 %s369_s15, 4  ;;  %s18_s16 = int_to_ptr.vmem [resolvable:$true] %s17_s16 }
   0x4   :  { %s311_s17 = scalar_lea.vmem %s18_s16, 256  ;;  %p316_p1 = scmp.lt.s32.totalorder %s18_s16, %s18_s16 }
   0x5   :  { %p312_p0 = scmp.ne.s32.totalorder %s18_s16, %s311_s17  ;;  %p317_p2 = scmp.lt.s32.totalorder %s311_s17, %s311_s17 }
   0x7   :  { %p318_p3 = por %p317_p2, %p316_p1 }
   0x9   :  { %p319_p4 = pnand %p318_p3, %p312_p0 }
   0xb   :  { %322 = shalt.err (!%p319_p4)
}
   0xc   :  { %s370_s18 = smov 128   ;;  %s371_s19 = smov 8  }
   0xd   :  { %23 = dma.hbm_to_vmem [thread:$0]  %s418_s0, 256, %s18_s16, [#allocation3], %s370_s18, %s370_s18, %s371_s19  }
   0xe   :  { %s372_s22 = smov [#allocation5]  }
   0xf   :  { %s29_s23 = sshll.u32 %s372_s22, 4  ;;  %s30_s23 = int_to_ptr.vmem [resolvable:$true] %s29_s23 }
  0x10   :  { %s331_s24 = scalar_lea.vmem %s30_s23, 2048  ;;  %p336_p6 = scmp.lt.s32.totalorder %s30_s23, %s30_s23 }
  0x11   :  { %p332_p5 = scmp.ne.s32.totalorder %s30_s23, %s331_s24  ;;  %p337_p7 = scmp.lt.s32.totalorder %s331_s24, %s331_s24 }
  0x13   :  { %p338_p8 = por %p337_p7, %p336_p6 }
  0x15   :  { %p339_p9 = pnand %p338_p8, %p332_p5 }
  0x17   :  { %342 = shalt.err (!%p339_p9)
}
  0x18   :  { %35 = dma.hbm_to_vmem [thread:$0]  %s419_s1, 2048, %s30_s23, [#allocation6], %s370_s18, %s370_s18, %s371_s19  }
  0x19   :  { %363 = dma.done.wait [#allocation3], 256  }
  0x1a   :  { %364 = vsyncadd [#allocation3], 4294967040 }
  0x1b   :  { %365 = dma.done.wait [#allocation6], 2048  }
  0x1c   :  { %366 = vsyncadd [#allocation6], 4294965248  ;;  %v63_v0 = vld [vmem:[#allocation5 + $0x78] sm:$0xff]  ;;  %v62_v1 = vld [vmem:[#allocation5 + $0x70] sm:$0xff]  ;;  %vm211_vm0 = vcmask 1041409  }
  0x1d   :  { %251 = vmatprep.subr.mxu0 %v63_v0  ;;  %v61_v2 = vld [vmem:[#allocation5 + $0x68] sm:$0xff]  ;;  %v405_v3 = vld [vmem:[#allocation2] sm:$0xff]  ;;  %v60_v4 = vld [vmem:[#allocation5 + $0x60] sm:$0xff] }
  0x1e   :  { %252 = vmatpush3.xpose.msra.mxu0 %v63_v0  ;;  %283 = vmatprep.mubr.f32.mxu0 %v405_v3  ;;  %v59_v5 = vld [vmem:[#allocation5 + $0x58] sm:$0xff]  ;;  %v58_v6 = vld [vmem:[#allocation5 + $0x50] sm:$0xff]  ;;  %v57_v7 = vld [vmem:[#allocation5 + $0x48] sm:$0xff] }
  0x1f   :  { %253 = vmatprep.subr.mxu0 %v62_v1  ;;  %v56_v8 = vld [vmem:[#allocation5 + $0x40] sm:$0xff]  ;;  %v55_v9 = vld [vmem:[#allocation5 + $0x38] sm:$0xff]  ;;  %v54_v10 = vld [vmem:[#allocation5 + $0x30] sm:$0xff] }
  0x20   :  { %v53_v11 = vld [vmem:[#allocation5 + $0x28] sm:$0xff]  ;;  %v52_v12 = vld [vmem:[#allocation5 + $0x20] sm:$0xff]  ;;  %v51_v13 = vld [vmem:[#allocation5 + $0x18] sm:$0xff] }
  0x21   :  { %v50_v14 = vld [vmem:[#allocation5 + $0x10] sm:$0xff]  ;;  %v49_v15 = vld [vmem:[#allocation5 + $0x8] sm:$0xff]  ;;  %v48_v16 = vld [vmem:[#allocation5] sm:$0xff] }
  0x22   :  { %254 = vmatpush3.xpose.msra.mxu0 %v62_v1  ;;  %v47_v17 = vld [vmem:[#allocation2 + $0x8] sm:$0xff]  ;;  %v231_v19 = vld [vmem:[%s420_s2] ss:$0 sm:$0xff]  ;;  %s373_s2 = smov [#allocation7]  }
  0x23   :  { %255 = vmatprep.subr.mxu0 %v61_v2  ;;  %v232_v24 = vld [vmem:[%s421_s3] ss:$0 sm:$0xff]  ;;  %s221_s3 = sshll.u32 %s373_s2, 4  ;;  %s222_s3 = int_to_ptr.vmem [resolvable:$true] %s221_s3 }
  0x24   :  { %s343_s29 = scalar_lea.vmem %s222_s3, 32  ;;  %p348_p11 = scmp.lt.s32.totalorder %s222_s3, %s222_s3 }
  0x25   :  { %p344_p10 = scmp.ne.s32.totalorder %s222_s3, %s343_s29  ;;  %p349_p12 = scmp.lt.s32.totalorder %s343_s29, %s343_s29 }
  0x26   :  { %256 = vmatpush3.xpose.msra.mxu0 %v61_v2 }
  0x27   :  { %257 = vmatprep.subr.mxu0 %v60_v4  ;;  %p350_p13 = por %p349_p12, %p348_p11 }
  0x29   :  { %p351_p0 = pnand %p350_p13, %p344_p10 }
  0x2a   :  { %258 = vmatpush3.xpose.msra.mxu0 %v60_v4 }
  0x2b   :  { %259 = vmatprep.subr.mxu0 %v59_v5 }
  0x2e   :  { %260 = vmatpush3.xpose.msra.mxu0 %v59_v5 }
  0x2f   :  { %261 = vmatprep.subr.mxu0 %v58_v6 }
  0x32   :  { %262 = vmatpush3.xpose.msra.mxu0 %v58_v6 }
  0x33   :  { %263 = vmatprep.subr.mxu0 %v57_v7 }
  0x36   :  { %264 = vmatpush3.xpose.msra.mxu0 %v57_v7 }
  0x37   :  { %265 = vmatprep.subr.mxu0 %v56_v8 }
  0x3a   :  { %266 = vmatpush3.xpose.msra.mxu0 %v56_v8 }
  0x3b   :  { %267 = vmatprep.subr.mxu0 %v55_v9 }
  0x3e   :  { %268 = vmatpush3.xpose.msra.mxu0 %v55_v9 }
  0x3f   :  { %269 = vmatprep.subr.mxu0 %v54_v10 }
  0x42   :  { %270 = vmatpush3.xpose.msra.mxu0 %v54_v10 }
  0x43   :  { %271 = vmatprep.subr.mxu0 %v53_v11 }
  0x46   :  { %272 = vmatpush3.xpose.msra.mxu0 %v53_v11 }
  0x47   :  { %273 = vmatprep.subr.mxu0 %v52_v12 }
  0x4a   :  { %274 = vmatpush3.xpose.msra.mxu0 %v52_v12 }
  0x4b   :  { %275 = vmatprep.subr.mxu0 %v51_v13 }
  0x4e   :  { %276 = vmatpush3.xpose.msra.mxu0 %v51_v13 }
  0x4f   :  { %277 = vmatprep.subr.mxu0 %v50_v14 }
  0x52   :  { %278 = vmatpush3.xpose.msra.mxu0 %v50_v14 }
  0x53   :  { %279 = vmatprep.subr.mxu0 %v49_v15 }
  0x56   :  { %280 = vmatpush3.xpose.msra.mxu0 %v49_v15 }
  0x57   :  { %281 = vmatprep.subr.mxu0 %v48_v16 }
  0x5a   :  { %282 = vmatpush3.xpose.msra.mxu0 %v48_v16 }
  0x5d   :  { %284 = vmatmul.mubr.f32.vlgmr.msra.gmra.mxu0 %v47_v17 }
 0x11d   :  { %v285_v18 = vpop.f32.mrf.mxu0 }
 0x11e   :  { %v143_v21 = vadd.f32 %v285_v18, %v231_v19 }
 0x11f   :  { %v137_v20 = vpop.f32.mrf.mxu0 }
 0x120   :  { %v138_v22 = vadd.f32 %v231_v19, %v137_v20 }
 0x122   :  { %291 = vtanh.f32 %v138_v22 }
 0x123   :  { %293 = vtanh.f32 %v143_v21 }
 0x12f   :  { %v292_v23 = vpop.eup %291 }
 0x130   :  { %v155_v25 = vmul.f32 %v292_v23, %v232_v24  ;;  %v294_v26 = vpop.eup %293 }
 0x131   :  { %v156_v27 = vmul.f32 %v294_v26, %v232_v24 }
 0x132   :  { %157 = vadd.xlane.f32.xlu0 %v155_v25 }
 0x136   :  { %159 = vadd.xlane.f32.xlu0 %v156_v27 }
 0x1bb   :  { %v158_v28 = vpop.xlane.xlu0 %157 }
 0x1bc   :  { %v161_v29 = vrot.slane %v158_v28, 4 }
 0x1be   :  { %v162_v30 = vmax.f32 %v158_v28, %v161_v29 }
 0x1bf   :  { %v160_v31 = vpop.xlane.xlu0 %159 }
 0x1c0   :  { %v163_v32 = vrot.slane %v162_v30, 2  ;;  %v167_v33 = vrot.slane %v160_v31, 4 }
 0x1c2   :  { %v164_v34 = vmax.f32 %v162_v30, %v163_v32  ;;  %v168_v35 = vmax.f32 %v160_v31, %v167_v33 }
 0x1c4   :  { %v165_v36 = vrot.slane %v164_v34, 1  ;;  %v169_v37 = vrot.slane %v168_v35, 2 }
 0x1c6   :  { %v166_v38 = vmax.f32 %v164_v34, %v165_v36  ;;  %v170_v39 = vmax.f32 %v168_v35, %v169_v37 }
 0x1c8   :  { %v173_v40 = vsub.f32 %v158_v28, %v166_v38  ;;  %v171_v41 = vrot.slane %v170_v39, 1 }
 0x1ca   :  { %v175_v42 = vmul.f32 1.442695, %v173_v40  ;;  %v172_v43 = vmax.f32 %v170_v39, %v171_v41 }
 0x1cc   :  { %295 = vpow2.f32 %v175_v42  ;;  %v174_v44 = vsub.f32 %v160_v31, %v172_v43 }
 0x1ce   :  { %v177_v45 = vmul.f32 1.442695, %v174_v44 }
 0x1d0   :  { %297 = vpow2.f32 %v177_v45 }
 0x1d9   :  { %v296_v46 = vpop.eup %295 }
 0x1da   :  { %v179_v47 = vrot.slane %v296_v46, 4 }
 0x1dc   :  { %v180_v48 = vadd.f32 %v296_v46, %v179_v47 }
 0x1dd   :  { %v298_v49 = vpop.eup %297 }
 0x1de   :  { %v185_v50 = vrot.slane %v298_v49, 4  ;;  %v181_v51 = vrot.slane %v180_v48, 2 }
 0x1e0   :  { %v182_v52 = vadd.f32 %v181_v51, %v180_v48  ;;  %v186_v53 = vadd.f32 %v298_v49, %v185_v50 }
 0x1e2   :  { %v183_v54 = vrot.slane %v182_v52, 1  ;;  %v187_v55 = vrot.slane %v186_v53, 2 }
 0x1e4   :  { %v184_v56 = vadd.f32 %v183_v54, %v182_v52  ;;  %v188_v57 = vadd.f32 %v187_v55, %v186_v53 }
 0x1e6   :  { %v189_v58 = vrot.slane %v188_v57, 1  ;;  %299 = vrcp.f32 %v184_v56 }
 0x1e8   :  { %v190_v59 = vadd.f32 %v189_v58, %v188_v57 }
 0x1ea   :  { %301 = vrcp.f32 %v190_v59 }
 0x1f3   :  { %v300_v60 = vpop.eup %299 }
 0x1f4   :  { %v193_v61 = vmul.f32 %v300_v60, %v296_v46 }
 0x1f6   :  { %v195_v62 = vmul.f32 %v193_v61, %v405_v3 }
 0x1f7   :  { %v302_v63 = vpop.eup %301 }
 0x1f8   :  { %v194_v0 = vmul.f32 %v302_v63, %v298_v49  ;;  %v197_v1 = vrot.slane %v195_v62, 4 }
 0x1fa   :  { %v196_v2 = vmul.f32 %v194_v0, %v47_v17  ;;  %v198_v4 = vadd.f32 %v197_v1, %v195_v62 }
 0x1fc   :  { %v199_v5 = vrot.slane %v198_v4, 2  ;;  %v203_v6 = vrot.slane %v196_v2, 4 }
 0x1fe   :  { %v200_v7 = vadd.f32 %v199_v5, %v198_v4  ;;  %v204_v8 = vadd.f32 %v203_v6, %v196_v2 }
 0x200   :  { %v205_v9 = vrot.slane %v204_v8, 2  ;;  %v201_v10 = vrot.slane %v200_v7, 1 }
 0x202   :  { %v206_v11 = vadd.f32 %v205_v9, %v204_v8  ;;  %v202_v13 = vadd.f32 %v201_v10, %v200_v7 }
 0x204   :  { %v207_v12 = vrot.slane %v206_v11, 1 }
 0x206   :  { %v208_v14 = vadd.f32 %v207_v12, %v206_v11 }
 0x208   :  { %v212_v3 = vsel %vm211_vm0, %v208_v14, %v202_v13 }
 0x209   :  { %214 = vst [vmem:[#allocation7] sm:$0x3] %v212_v3 }
 0x20a   :  { %354 = shalt.err (!%p351_p0)
}
 0x20b   :  { %224 = dma.vmem_to_hbm [thread:$0]  %s222_s3, 32, %s422_s4, [#allocation4]  }
 0x20c   :  { %367 = dma.done.wait [#allocation4], 32  }
 0x20d   :  { %368 = vsyncadd [#allocation4], 4294967264 }
 0x20e   :  { %228 = vsyncpa [#allocation3], 1 }
 0x20f   :  { %229 = vsyncpa [#allocation6], 1 }
 0x210   :  { %230 = vsyncpa [#allocation4], 1 }

</bundles_post_ra>
